<compile_context>
chip_gen: v5e
topology: v5e:2x2
jax: 0.10.0
libtpu: 0.0.40
codegen_flags: <defaults>
</compile_context>

<pallas_src>
import jax
import jax.numpy as jnp
from jax.experimental import pallas as pl
from jax.experimental.pallas import tpu as pltpu


def _round_up(x: int, m: int) -> int:
    return ((x + m - 1) // m) * m


def _cdiv(a: int, b: int) -> int:
    return -(-a // b)


# ~2 MiB per input block: well into the >=85%-of-roofline regime measured on
# v6e, while in+out double-buffered stays ~8 MiB of VMEM (fine on v5e/v6e/v7x).
_TARGET_BLOCK_BYTES = 2 * 1024 * 1024


def _drop_path_kernel(x_ref, s_ref, o_ref):
    # x_ref: (TB, TILE_N) tile of the flattened input.
    # s_ref: (TB, 1) per-sample scale in {0, 1/keep_prob} (f32).
    # Pure VPU broadcast-multiply; the kernel is HBM-bandwidth bound.
    o_ref[...] = (x_ref[...].astype(jnp.float32) * s_ref[...]).astype(o_ref.dtype)


def drop_path_s(x, drop_prob: float = 0.0, training: bool = False, key=None):
    """JAX/Pallas equivalent of DropPath_s.forward (drop_path_f_s)."""
    if drop_prob == 0.0 or not training:
        return x
    if key is None:
        raise ValueError(
            "drop_path_s requires an explicit PRNG key when training with "
            "drop_prob > 0 (torch draws fresh randomness each forward).")
    keep_prob = 1.0 - drop_prob

    B = x.shape[0]
    N = 1
    for d in x.shape[1:]:
        N *= d
    x2 = x.reshape(B, N)

    # Per-sample keep in {0., 1.}: floor(keep_prob + U[0,1)), as in torch, with
    # 1/keep_prob folded in so the kernel is a single multiply.
    u = jax.random.uniform(key, (B,), dtype=jnp.float32)
    keep = jnp.floor(jnp.float32(keep_prob) + u)
    scales = (keep * jnp.float32(1.0 / keep_prob)).reshape(B, 1)

    itemsize = jnp.dtype(x.dtype).itemsize
    sublane = max(8, 32 // itemsize)        # 8 f32 / 16 bf16 / 32 int8 packing

    # Lane (feature) tile: multiple of 128, <= N, within the byte budget for a
    # minimal-sublane block, and (nearly) dividing N.
    if N <= 128:
        tile_n = N                          # full dim (allowed even if < 128)
    else:
        max_tile_n = max(128, (_TARGET_BLOCK_BYTES // (sublane * itemsize)) // 128 * 128)
        cap = min(max_tile_n, (N // 128) * 128)
        pieces = _cdiv(N, cap)
        tile_n = min(cap, _round_up(_cdiv(N, pieces), 128))

    # Sublane (sample) tile: grow it when tile_n is small so each block still
    # moves ~_TARGET_BLOCK_BYTES; keep it a sublane-pack multiple and <= B.
    if B <= sublane:
        tb = B                              # full dim
    else:
        target_rows = max(sublane, _TARGET_BLOCK_BYTES // (tile_n * itemsize))
        tb = min((B // sublane) * sublane, (target_rows // sublane) * sublane)

    grid_b = _cdiv(B, tb)
    grid_n = _cdiv(N, tile_n)

    # If everything collapsed into one block but there is real work, split the
    # larger axis so v7x's two TensorCores both get an HBM stream.
    if grid_b == 1 and grid_n == 1 and B * N * itemsize >= (1 << 20):
        if B > sublane:
            tb = min((B // sublane) * sublane,
                     max(sublane, _round_up(_cdiv(B, 2), sublane)))
            grid_b = _cdiv(B, tb)
        elif N > 128:
            tile_n = min((N // 128) * 128, _round_up(_cdiv(N, 2), 128))
            grid_n = _cdiv(N, tile_n)

    # Feature axis innermost when there are multiple batch blocks (scale block
    # index constant across the inner loop -> its DMA is skipped).  Single
    # batch block: lead with the feature axis for an even 2-core split.
    if grid_b == 1 and grid_n > 1:
        grid = (grid_n, grid_b)
        x_map = lambda j, i: (i, j)
        s_map = lambda j, i: (i, 0)
    else:
        grid = (grid_b, grid_n)
        x_map = lambda i, j: (i, j)
        s_map = lambda i, j: (i, 0)

    out = pl.pallas_call(
        _drop_path_kernel,
        out_shape=jax.ShapeDtypeStruct((B, N), x.dtype),
        grid=grid,
        in_specs=[
            pl.BlockSpec((tb, tile_n), x_map),
            pl.BlockSpec((tb, 1), s_map),
        ],
        out_specs=pl.BlockSpec((tb, tile_n), x_map),
        compiler_params=pltpu.CompilerParams(
            dimension_semantics=("parallel", "parallel"),
            # v5e's default scoped VMEM is 16 MiB; raise it so the ~2 MiB
            # blocks (in + out, double-buffered ~= 8 MiB) always fit.  Still
            # well under v7x's 64 MiB physical VMEM.
            vmem_limit_bytes=32 * 1024 * 1024,
        ),
        # Note: input_output_aliases={0: 0} would remove the separate output
        # allocation when callers donate x; omitted so x remains usable here.
    )(x2, scales)

    return out.reshape(x.shape)


if __name__ == "__main__":
    key = jax.random.PRNGKey(0)
    x = jax.random.normal(key, (2, 4, 16, 16), dtype=jnp.float32)

    drop_prob = 0.25
    keep_prob = 1.0 - drop_prob

    y = jax.block_until_ready(
        drop_path_s(x, drop_prob=drop_prob, training=True,
                    key=jax.random.PRNGKey(1234)))

    # Sanity check: each sample is either all-zero or exactly x / keep_prob.
    ok = True
    for b in range(x.shape[0]):
        yb, xb = y[b], x[b]
        dropped = bool(jnp.all(yb == 0.0))
        kept = bool(jnp.allclose(yb, xb / keep_prob, rtol=1e-6, atol=1e-6))
        ok = ok and (dropped or kept)

    # Identity paths: eval mode and drop_prob == 0.
    ok = ok and bool(jnp.array_equal(drop_path_s(x, drop_prob, training=False), x))
    ok = ok and bool(jnp.array_equal(
        drop_path_s(x, 0.0, training=True, key=jax.random.PRNGKey(3)), x))

    # Non-aligned shape (B and N not multiples of 8/128) to exercise the
    # no-padding boundary-block masking path.
    x_odd = jax.random.normal(jax.random.PRNGKey(7), (3, 5, 7, 9), dtype=jnp.float32)
    y_odd = jax.block_until_ready(
        drop_path_s(x_odd, drop_prob=drop_prob, training=True,
                    key=jax.random.PRNGKey(99)))
    for b in range(x_odd.shape[0]):
        yb, xb = y_odd[b], x_odd[b]
        ok = ok and (bool(jnp.all(yb == 0.0))
                     or bool(jnp.allclose(yb, xb / keep_prob, rtol=1e-6, atol=1e-6)))

    print("KERNEL_OK" if ok else "KERNEL_MISMATCH")
</pallas_src>

<mosaic_0001>
module attributes {stable_mosaic.version = 11 : i64} {
  func.func @_drop_path_kernel(%arg0: i32, %arg1: i32, %arg2: memref<2x1024xf32, #tpu.memory_space<vmem>>, %arg3: memref<2x1xf32, #tpu.memory_space<vmem>>, %arg4: memref<2x1024xf32, #tpu.memory_space<vmem>>) attributes {dimension_semantics = [#tpu.dimension_semantics<parallel>, #tpu.dimension_semantics<parallel>], iteration_bounds = array<i64: 1, 1>, scalar_prefetch = 0 : i64, scratch_operands = 0 : i64, tpu.core_type = #tpu.core_type<tc>, window_params = [{transform_indices = @transform_0, window_bounds = array<i64: 2, 1024>}, {transform_indices = @transform_1, window_bounds = array<i64: 2, 1>}, {transform_indices = @transform_2, window_bounds = array<i64: 2, 1024>}]} {
    %c0 = arith.constant 0 : index
    %c0_0 = arith.constant 0 : index
    %0 = vector.load %arg2[%c0, %c0_0] : memref<2x1024xf32, #tpu.memory_space<vmem>>, vector<2x1024xf32>
    %c0_1 = arith.constant 0 : index
    %c0_2 = arith.constant 0 : index
    %1 = vector.load %arg3[%c0_1, %c0_2] : memref<2x1xf32, #tpu.memory_space<vmem>>, vector<2x1xf32>
    %2 = vector.broadcast %1 : vector<2x1xf32> to vector<2x1024xf32>
    %3 = arith.mulf %0, %2 : vector<2x1024xf32>
    %c0_3 = arith.constant 0 : index
    %c0_4 = arith.constant 0 : index
    %4 = vector.load %arg4[%c0_3, %c0_4] : memref<2x1024xf32, #tpu.memory_space<vmem>>, vector<2x1024xf32>
    tpu.vector_store %arg4[%c0_3, %c0_4], %3 {strides = array<i32>} : memref<2x1024xf32, #tpu.memory_space<vmem>>, vector<2x1024xf32>,
    return
  }
  func.func @transform_0(%arg0: i32, %arg1: i32) -> (i32, i32) {
    %c0_i32 = arith.constant 0 : i32
    return %arg0, %arg1 : i32, i32
  }
  func.func @transform_1(%arg0: i32, %arg1: i32) -> (i32, i32) {
    %c0_i32 = arith.constant 0 : i32
    %c0_i32_0 = arith.constant 0 : i32
    return %arg0, %c0_i32 : i32, i32
  }
  func.func @transform_2(%arg0: i32, %arg1: i32) -> (i32, i32) {
    %c0_i32 = arith.constant 0 : i32
    return %arg0, %arg1 : i32, i32
  }
}

</mosaic_0001>

<bundles_post_ra>
// kernel: tpu_custom_call.1
= control target key start
LH: loop header
LB: loop body
LE: loop exit
PB: predicated region body
PF: predicated region fallthrough
CT: control target
= control target key end

     0   :  { %7 = vsyncpa [#allocation3], 0  ;;  %s144_s0 = inlined_call_operand.hbm [shape: f32[2,1024], index: 0, kind: input, shape index: {}]   ;;  %s145_s1 = inlined_call_operand.vmem [shape: f32[2,1], index: 1, kind: input, shape index: {}]   ;;  %s146_s2 = inlined_call_operand.hbm [shape: f32[2,1024], index: 2, kind: output, shape index: {}]  }
   0x1   :  { %8 = vsyncpa [#allocation4], 0  ;;  %s14_s11 = sshll.u32 %s144_s0, 4  ;;  %s116_s12 = smov [#allocation2]   ;;  %s15_s11 = int_to_ptr.hbm [resolvable:$true] %s14_s11 }
   0x2   :  { %s16_s13 = sshll.u32 %s116_s12, 4  ;;  %s17_s13 = int_to_ptr.vmem [resolvable:$true] %s16_s13 }
   0x3   :  { %19 = dma.hbm_to_vmem [thread:$0]  %s15_s11, 256, %s17_s13, [#allocation3]  }
   0x4   :  { %112 = dma.done.wait [#allocation3], 256  }
   0x5   :  { %113 = vsyncadd [#allocation3], 4294967040  ;;  %v117_v0 = vmov 0   ;;  %v28_v1 = vld [vmem:[%s145_s1] sm:$0x3]  ;;  %v27_v7 = vld [vmem:[#allocation2 + $0x8] sm:$0xff] }
   0x6   :  { %63 = vset.pattern.permute.xlu0 %v117_v0  ;;  %v118_v2 = vmov 269488144   ;;  %v26_v6 = vld [vmem:[#allocation2] sm:$0xff]  ;;  %s119_s0 = smov [#allocation5]   ;;  %s49_s19 = sshll.u32 %s146_s2, 4  ;;  %s50_s19 = int_to_ptr.hbm [resolvable:$true] %s49_s19 }
   0x7   :  { %31 = vperm.xlu0 %63, %v28_v1   ;;  %v34_v3 = vunpack.c.l.s4 %v118_v2  ;;  %s47_s16 = sshll.u32 %s119_s0, 4  ;;  %s48_s16 = int_to_ptr.vmem [resolvable:$true] %s47_s16 }
   0x9   :  { %v35_v4 = vunpack.c.0.s8 %v34_v3 }
  0x79   :  { %v32_v5 = vpop.permute.xlu0 %31 }
  0x7a   :  { %v36_v8 = vperm.slane %v32_v5, %v35_v4 }
  0x7c   :  { %v38_v9 = vmul.f32 %v36_v8, %v26_v6  ;;  %v39_v10 = vmul.f32 %v36_v8, %v27_v7 }
  0x7e   :  { %40 = vst [vmem:[#allocation5] sm:$0xff] %v38_v9 }
  0x7f   :  { %41 = vst [vmem:[#allocation5 + $0x8] sm:$0xff] %v39_v10 }
  0x80   :  { %52 = dma.vmem_to_hbm [thread:$0]  %s48_s16, 256, %s50_s19, [#allocation4]  }
  0x81   :  { %114 = dma.done.wait [#allocation4], 256  }
  0x82   :  { %115 = vsyncadd [#allocation4], 4294967040 }
  0x83   :  { %57 = vsyncpa [#allocation3], 1 }
  0x84   :  { %58 = vsyncpa [#allocation4], 1 }

</bundles_post_ra>
